<compile_context>
chip_gen: v7x
topology: tpu7x:2x2x1
jax: 0.10.0
libtpu: 0.0.40
codegen_flags: <defaults>
</compile_context>

<pallas_src>
import functools

import jax
import jax.numpy as jnp
from jax.experimental import pallas as pl
from jax.experimental.pallas import tpu as pltpu


def _round_up(x, m):
    return (x + m - 1) // m * m


def _mlp_kernel(x_ref, w1_ref, b1_ref, w2_ref, b2_ref, o_ref):
    """Fused hot path: tanh(x @ W1 + b1) @ W2 + b2 for one batch tile."""
    # Fused f32 -> compute-dtype cast on-chip (no separate HBM convert pass).
    x = x_ref[...].astype(w1_ref.dtype)                   # (bt, D_in)
    h = jnp.dot(x, w1_ref[...],
                preferred_element_type=jnp.float32)       # MXU, f32 accumulation
    h = jnp.tanh(h + b1_ref[...])                         # f32 bias add + EUP tanh
    h = h.astype(w2_ref.dtype)                            # back to compute dtype
    o = jnp.dot(h, w2_ref[...],
                preferred_element_type=jnp.float32)       # MXU, f32 accumulation
    o_ref[...] = (o + b2_ref[...]).astype(o_ref.dtype)


def prepare_params(w1, b1, w2, b2, compute_dtype=jnp.bfloat16):
    """Pad + cast parameters ONCE (outside the per-call path).

    w1 : (D_in, D_hid)   b1 : (D_hid,) or (1, D_hid)
    w2 : (D_hid, D_out)  b2 : (D_out,) or (1, D_out)
    Returns lane-dense padded (W1p, b1p, W2p, b2p); weights in compute_dtype,
    biases in f32. Zero padding is exact: padded hidden cols are tanh(0+0)=0
    and the padded W2 rows are zero, so valid outputs are unchanged.
    """
    cdt = jnp.dtype(compute_dtype)
    d_in, d_hid = w1.shape
    d_out = w2.shape[1]
    assert w2.shape[0] == d_hid
    d_hid_p = _round_up(d_hid, 128)
    d_out_p = _round_up(d_out, 128)

    w1p = jnp.pad(w1, ((0, 0), (0, d_hid_p - d_hid))).astype(cdt)
    b1p = jnp.pad(jnp.asarray(b1).reshape(1, -1),
                  ((0, 0), (0, d_hid_p - d_hid))).astype(jnp.float32)
    w2p = jnp.pad(w2, ((0, d_hid_p - d_hid),
                       (0, d_out_p - d_out))).astype(cdt)
    b2p = jnp.pad(jnp.asarray(b2).reshape(1, -1),
                  ((0, 0), (0, d_out_p - d_out))).astype(jnp.float32)
    return w1p, b1p, w2p, b2p


@functools.partial(jax.jit, static_argnames=("d_out", "batch_tile", "out_dtype"))
def network_forward(x, w1p, b1p, w2p, b2p, *, d_out, batch_tile=512,
                    out_dtype=jnp.float32):
    """Pallas forward pass.

    x    : (B, D_in)          float32 (cast to compute dtype inside the kernel)
    w1p  : (D_in, D_hid_p)    compute dtype (from prepare_params)
    b1p  : (1, D_hid_p)       float32
    w2p  : (D_hid_p, D_out_p) compute dtype
    b2p  : (1, D_out_p)       float32
    d_out: original (unpadded) output width (static)
    returns (B, d_out) in out_dtype
    """
    B, d_in = x.shape
    d_hid_p = w1p.shape[1]
    d_out_p = w2p.shape[1]
    assert w1p.shape[0] == d_in and w2p.shape[0] == d_hid_p
    assert b1p.shape == (1, d_hid_p) and b2p.shape == (1, d_out_p)
    assert 0 < d_out <= d_out_p
    assert batch_tile > 0, "batch_tile must be positive"

    # --- batch tile / grid sizing -------------------------------------------
    # Multiple of 16 (bf16 sublane packing); split the batch (nearly) evenly
    # so ragged B is not grossly over-padded, and force >= 2 grid steps when
    # the batch allows so both v7x TensorCores get work ("parallel" axis).
    B16 = _round_up(max(B, 1), 16)
    bt = min(_round_up(batch_tile, 16), B16)
    n_steps = pl.cdiv(B16, bt)
    if n_steps < 2 and B16 >= 32:
        n_steps = 2
    bt = _round_up(pl.cdiv(B16, n_steps), 16)
    B_p = bt * n_steps

    # Only pad the batch when strictly necessary (no wrapper cast of x).
    xp = x if B_p == B else jnp.pad(x, ((0, B_p - B), (0, 0)))

    w_itemsize = jnp.dtype(w1p.dtype).itemsize
    out_itemsize = jnp.dtype(out_dtype).itemsize
    cost = pl.CostEstimate(
        flops=2 * B_p * (d_in * d_hid_p + d_hid_p * d_out_p),
        transcendentals=B_p * d_hid_p,
        bytes_accessed=(B_p * d_in * x.dtype.itemsize        # activations (f32 in)
                        + d_in * d_hid_p * w_itemsize        # W1
                        + d_hid_p * d_out_p * w_itemsize     # W2
                        + (d_hid_p + d_out_p) * 4            # biases (f32)
                        + B_p * d_out_p * out_itemsize),     # output
    )

    out = pl.pallas_call(
        _mlp_kernel,
        out_shape=jax.ShapeDtypeStruct((B_p, d_out_p), out_dtype),
        grid_spec=pltpu.PrefetchScalarGridSpec(
            num_scalar_prefetch=0,
            grid=(n_steps,),
            in_specs=[
                # activations: tiled over batch (f32, cast inside the kernel)
                pl.BlockSpec((bt, d_in), lambda i: (i, 0)),
                # weights / biases: constant block index -> stay VMEM-resident
                pl.BlockSpec((d_in, d_hid_p), lambda i: (0, 0)),
                pl.BlockSpec((1, d_hid_p), lambda i: (0, 0)),
                pl.BlockSpec((d_hid_p, d_out_p), lambda i: (0, 0)),
                pl.BlockSpec((1, d_out_p), lambda i: (0, 0)),
            ],
            # lane-dense (multiple-of-128) output -> unmasked vector stores
            out_specs=pl.BlockSpec((bt, d_out_p), lambda i: (i, 0)),
        ),
        compiler_params=pltpu.CompilerParams(
            dimension_semantics=("parallel",),   # batch axis -> both v7x TCs
        ),
        cost_estimate=cost,
    )(xp, w1p, b1p, w2p, b2p)

    # Strip batch / output-lane padding.
    return out[:B, :d_out]


def init_params(key, layer_sizes=(784, 200, 50)):
    """PyTorch-Linear-style init: U(-1/sqrt(fan_in), 1/sqrt(fan_in)).

    Weights stored as (in_features, out_features) - i.e. callers porting from
    PyTorch must transpose Linear.weight."""
    d_in, d_hid, d_out = layer_sizes
    k1, k2, k3, k4 = jax.random.split(key, 4)
    bound1 = 1.0 / jnp.sqrt(d_in)
    bound2 = 1.0 / jnp.sqrt(d_hid)
    w1 = jax.random.uniform(k1, (d_in, d_hid), jnp.float32, -bound1, bound1)
    b1 = jax.random.uniform(k2, (1, d_hid), jnp.float32, -bound1, bound1)
    w2 = jax.random.uniform(k3, (d_hid, d_out), jnp.float32, -bound2, bound2)
    b2 = jax.random.uniform(k4, (1, d_out), jnp.float32, -bound2, bound2)
    return w1, b1, w2, b2


def reference_forward(x, w1, b1, w2, b2, compute_dtype=jnp.float32):
    """Pure-JAX reference of the PyTorch forward pass (optionally with the
    same operand-dtype rounding the kernel uses, f32 accumulation)."""
    cdt = jnp.dtype(compute_dtype)
    xc, w1c, w2c = x.astype(cdt), w1.astype(cdt), w2.astype(cdt)
    h = jnp.tanh(jnp.dot(xc, w1c, preferred_element_type=jnp.float32)
                 + b1.reshape(1, -1))
    h = h.astype(cdt)
    return (jnp.dot(h, w2c, preferred_element_type=jnp.float32)
            + b2.reshape(1, -1))


if __name__ == "__main__":
    key = jax.random.PRNGKey(0)
    kx, kp = jax.random.split(key)

    layer_sizes = (784, 200, 50)
    batch = 32  # small demo batch; grid still splits into 2 tiles of 16 rows

    x = jax.random.normal(kx, (batch, layer_sizes[0]), jnp.float32)
    w1, b1, w2, b2 = init_params(kp, layer_sizes)

    # Parameters are padded/cast exactly once, outside the per-call hot path.
    w1p, b1p, w2p, b2p = prepare_params(w1, b1, w2, b2,
                                        compute_dtype=jnp.bfloat16)

    out = network_forward(x, w1p, b1p, w2p, b2p,
                          d_out=layer_sizes[-1], batch_tile=512)
    out = jax.block_until_ready(out)
    assert out.shape == (batch, layer_sizes[-1])
    assert jnp.all(jnp.isfinite(out))

    # Tight check against a reference with identical bf16 operand rounding
    # (f32 accumulation) -> verifies the kernel math itself.
    ref_bf16 = reference_forward(x, w1, b1, w2, b2, compute_dtype=jnp.bfloat16)
    assert jnp.allclose(out, ref_bf16, atol=2e-2, rtol=2e-2), \
        "mismatch vs bf16-consistent reference"

    # Loose sanity check against the pure-f32 PyTorch semantics
    # (bounds bf16 quantization error only).
    ref_f32 = reference_forward(x, w1, b1, w2, b2, compute_dtype=jnp.float32)
    assert jnp.allclose(out, ref_f32, atol=1e-1, rtol=1e-1), \
        "bf16 quantization error unexpectedly large vs f32 reference"

    print("KERNEL_OK")
</pallas_src>

<mosaic_0001>
module attributes {stable_mosaic.version = 11 : i64} {
  func.func @_mlp_kernel(%arg0: i32, %arg1: memref<16x784xf32, #tpu.memory_space<vmem>>, %arg2: memref<784x256xbf16, #tpu.memory_space<vmem>>, %arg3: memref<1x256xf32, #tpu.memory_space<vmem>>, %arg4: memref<256x128xbf16, #tpu.memory_space<vmem>>, %arg5: memref<1x128xf32, #tpu.memory_space<vmem>>, %arg6: memref<16x128xf32, #tpu.memory_space<vmem>>) attributes {dimension_semantics = [#tpu.dimension_semantics<parallel>], iteration_bounds = array<i64: 2>, scalar_prefetch = 0 : i64, scratch_operands = 0 : i64, tpu.core_type = #tpu.core_type<tc>, window_params = [{transform_indices = @transform_0, window_bounds = array<i64: 16, 784>}, {pipeline_mode = #tpu.pipeline_mode<synchronous>, transform_indices = @transform_1, window_bounds = array<i64: 784, 256>}, {pipeline_mode = #tpu.pipeline_mode<synchronous>, transform_indices = @transform_2, window_bounds = array<i64: 1, 256>}, {pipeline_mode = #tpu.pipeline_mode<synchronous>, transform_indices = @transform_3, window_bounds = array<i64: 256, 128>}, {pipeline_mode = #tpu.pipeline_mode<synchronous>, transform_indices = @transform_4, window_bounds = array<i64: 1, 128>}, {transform_indices = @transform_5, window_bounds = array<i64: 16, 128>}]} {
    %c0 = arith.constant 0 : index
    %c0_0 = arith.constant 0 : index
    %0 = vector.load %arg1[%c0, %c0_0] : memref<16x784xf32, #tpu.memory_space<vmem>>, vector<16x784xf32>
    %1 = arith.truncf %0 : vector<16x784xf32> to vector<16x784xbf16>
    %c0_1 = arith.constant 0 : index
    %c0_2 = arith.constant 0 : index
    %2 = vector.load %arg2[%c0_1, %c0_2] : memref<784x256xbf16, #tpu.memory_space<vmem>>, vector<784x256xbf16>
    %cst = arith.constant dense<0.000000e+00> : vector<16x256xf32>
    %3 = tpu.matmul %1, %2, %cst {dimension_numbers = #tpu.dot_dimension_numbers<[1], [0], [0], [1], [0, 0, 1, 1], [], []>} : vector<16x784xbf16>, vector<784x256xbf16>, vector<16x256xf32> -> vector<16x256xf32>
    %c0_3 = arith.constant 0 : index
    %c0_4 = arith.constant 0 : index
    %4 = vector.load %arg3[%c0_3, %c0_4] : memref<1x256xf32, #tpu.memory_space<vmem>>, vector<1x256xf32>
    %5 = vector.broadcast %4 : vector<1x256xf32> to vector<16x256xf32>
    %6 = arith.addf %3, %5 : vector<16x256xf32>
    %7 = math.tanh %6 : vector<16x256xf32>
    %8 = arith.truncf %7 : vector<16x256xf32> to vector<16x256xbf16>
    %c0_5 = arith.constant 0 : index
    %c0_6 = arith.constant 0 : index
    %9 = vector.load %arg4[%c0_5, %c0_6] : memref<256x128xbf16, #tpu.memory_space<vmem>>, vector<256x128xbf16>
    %cst_7 = arith.constant dense<0.000000e+00> : vector<16x128xf32>
    %10 = tpu.matmul %8, %9, %cst_7 {dimension_numbers = #tpu.dot_dimension_numbers<[1], [0], [0], [1], [0, 0, 1, 1], [], []>} : vector<16x256xbf16>, vector<256x128xbf16>, vector<16x128xf32> -> vector<16x128xf32>
    %c0_8 = arith.constant 0 : index
    %c0_9 = arith.constant 0 : index
    %11 = vector.load %arg5[%c0_8, %c0_9] : memref<1x128xf32, #tpu.memory_space<vmem>>, vector<1x128xf32>
    %12 = vector.broadcast %11 : vector<1x128xf32> to vector<16x128xf32>
    %13 = arith.addf %10, %12 : vector<16x128xf32>
    %c0_10 = arith.constant 0 : index
    %c0_11 = arith.constant 0 : index
    %14 = vector.load %arg6[%c0_10, %c0_11] : memref<16x128xf32, #tpu.memory_space<vmem>>, vector<16x128xf32>
    tpu.vector_store %arg6[%c0_10, %c0_11], %13 {strides = array<i32>} : memref<16x128xf32, #tpu.memory_space<vmem>>, vector<16x128xf32>,
    return
  }
  func.func @transform_0(%arg0: i32) -> (i32, i32) {
    %c0_i32 = arith.constant 0 : i32
    %c0_i32_0 = arith.constant 0 : i32
    return %arg0, %c0_i32 : i32, i32
  }
  func.func @transform_1(%arg0: i32) -> (i32, i32) {
    %c0_i32 = arith.constant 0 : i32
    %c0_i32_0 = arith.constant 0 : i32
    %c0_i32_1 = arith.constant 0 : i32
    return %c0_i32, %c0_i32_0 : i32, i32
  }
  func.func @transform_2(%arg0: i32) -> (i32, i32) {
    %c0_i32 = arith.constant 0 : i32
    %c0_i32_0 = arith.constant 0 : i32
    %c0_i32_1 = arith.constant 0 : i32
    return %c0_i32, %c0_i32_0 : i32, i32
  }
  func.func @transform_3(%arg0: i32) -> (i32, i32) {
    %c0_i32 = arith.constant 0 : i32
    %c0_i32_0 = arith.constant 0 : i32
    %c0_i32_1 = arith.constant 0 : i32
    return %c0_i32, %c0_i32_0 : i32, i32
  }
  func.func @transform_4(%arg0: i32) -> (i32, i32) {
    %c0_i32 = arith.constant 0 : i32
    %c0_i32_0 = arith.constant 0 : i32
    %c0_i32_1 = arith.constant 0 : i32
    return %c0_i32, %c0_i32_0 : i32, i32
  }
  func.func @transform_5(%arg0: i32) -> (i32, i32) {
    %c0_i32 = arith.constant 0 : i32
    %c0_i32_0 = arith.constant 0 : i32
    return %arg0, %c0_i32 : i32, i32
  }
}

</mosaic_0001>

<bundles_post_ra>
// kernel: network_forward.1
= control target key start
LH: loop header
LB: loop body
LE: loop exit
PB: predicated region body
PF: predicated region fallthrough
CT: control target
= control target key end

     0   :  { %10 = vsyncpa [#allocation3], 0  ;;  %s2243_s0 = inlined_call_operand.hbm [shape: f32[32,784], index: 0, kind: input, shape index: {}]   ;;  %s2244_s1 = inlined_call_operand.hbm [shape: bf16[784,256], index: 1, kind: input, shape index: {}]   ;;  %s2245_s2 = inlined_call_operand.vmem [shape: f32[1,256], index: 2, kind: input, shape index: {}]   ;;  %s2246_s3 = inlined_call_operand.hbm [shape: bf16[256,128], index: 3, kind: input, shape index: {}]   ;;  %s2247_s4 = inlined_call_operand.vmem [shape: f32[1,128], index: 4, kind: input, shape index: {}]   ;;  %s2248_s5 = inlined_call_operand.hbm [shape: f32[32,128], index: 5, kind: output, shape index: {}]  }
   0x1   :  { %12 = vsyncpa [#allocation3 + $0x1], 0 }
   0x2   :  { %13 = vsyncpa [#allocation6], 0 }
   0x3   :  { %14 = vsyncpa [#allocation4], 0 }
   0x4   :  { %16 = vsyncpa [#allocation4 + $0x1], 0  ;;  %s1986_s18 = smov 0   ;;  %s1988_s19 = smov 0  }
   0x5   :  { %s1990_s20 = smov 0   ;;  %s1992_s21 = smov 0  }
   0x6 LB: > { %s2007_s22 = sadd.s32 4294967295, %s1941_s21   ;;  %s1363_s23 = sadd.s32 4294967294, %s1941_s21   ;;  %s1941_s21 = sphi %s1992_s21, %s2268_s21   ;;  %s1937_s20 = sphi %s1990_s20, %s2267_s20   ;;  %s1933_s19 = sphi %s1988_s19, %s2266_s19   ;;  %s1929_s18 = sphi %s1986_s18, %s2265_s18  }
   0x7   : > { %p42_p0 = scmp.ne.s32.totalorder %s1933_s19, %s1929_s18  ;;  %p2249_p1 = scmp.eq.s32.totalorder %s2007_s22, 0 }
   0x8   : > { %p156_p3 = scmp.eq.s32.totalorder %s1363_s23, 1  ;;  %p1364_p5 = scmp.ge.s32.totalorder %s1941_s21, 1 }
   0x9   : > { %p2016_p4 = por %p2249_p1, %p42_p0  ;;  %p163_p7 = scmp.lt.s32.totalorder %s1941_s21, 3 }
   0xa   : > { %p2021_p6 = por %p156_p3, %p42_p0  ;;  %s1943_s27 = smov [#allocation5]  }
   0xb   : > { %s2252_s24 = scalar_select %p2016_p4, 1, 0 }
   0xc   : > { %s2253_s25 = scalar_select %p2021_p6, 1, 0 }
   0xd   : > { %p2026_p8 = pnand %p1364_p5, %p163_p7  ;;  %s175_s28 = sshll.u32 %s1943_s27, 4  ;;  %s2030_s28 = int_to_ptr.vmem [resolvable:$true] %s175_s28 }
   0xe   : > { %s1944_s30 = smov [#allocation7]   ;;  %s1785_s9 = scalar_lea.hbm %s2244_s1, 12544 }
   0xf   : > { %p1550_p9 = pneg %p2026_p8  ;;  %s191_s6 = sshll.u32 %s1944_s30, 4  ;;  %s2041_s6 = int_to_ptr.vmem [resolvable:$true] %s191_s6 }
  0x10   : > { %p1786_p12 = scmp.ne.s32.totalorder %s2244_s1, %s1785_s9  ;;  %p1792_p5 = scmp.lt.u32.totalorder %s1785_s9, %s2244_s1 }
  0x11   : > { %p2037_p11 = pnand %p1550_p9, %p2249_p1 }
  0x13   : > { %p1787_p13 = pneg %p2037_p11 }
  0x15   : > { %p1788_p0 = pnand %p1787_p13, %p1786_p12 }
  0x17   : > { %p1789_p3 = pneg %p1788_p0 }
  0x19   : > { %p1794_p7 = pnand %p1792_p5, %p1789_p3 }
  0x1b   : > { %1797 = shalt.err (!%p1794_p7)
}
  0x1c   : > { %s1798_s14 = scalar_lea.vmem %s2030_s28, 12544  ;;  %p1806_p2 = scmp.lt.s32.totalorder %s2030_s28, %s2030_s28 }
  0x1d   : > { %p1799_p9 = scmp.ne.s32.totalorder %s2030_s28, %s1798_s14  ;;  %p1807_p12 = scmp.lt.s32.totalorder %s1798_s14, %s1798_s14 }
  0x1f   : > { %p1801_p10 = pnand %p1799_p9, %p1787_p13  ;;  %p1808_p0 = por %p1807_p12, %p1806_p2 }
  0x21   : > { %p1802_p1 = pneg %p1801_p10 }
  0x23   : > { %p1809_p6 = pnand %p1808_p0, %p1802_p1 }
  0x25   : > { %1812 = shalt.err (!%p1809_p6)
}
  0x26   : > { %s1945_s15 = smov 128   ;;  %s1946_s16 = smov 8  }
  0x27   : > { %1553 = dma.hbm_to_vmem [thread:$0]  (!%p2037_p11), %s2244_s1, 12544, %s2030_s28, [#allocation6], %s1945_s15, %s1945_s15, %s1946_s16  }
  0x28   : > { %s1813_s7 = scalar_lea.hbm %s2246_s3, 2048 }
  0x29   : > { %p1814_p2 = scmp.ne.s32.totalorder %s2246_s3, %s1813_s7  ;;  %p1820_p10 = scmp.lt.u32.totalorder %s1813_s7, %s2246_s3 }
  0x2b   : > { %p1816_p1 = pnand %p1814_p2, %p1787_p13 }
  0x2d   : > { %p1817_p6 = pneg %p1816_p1 }
  0x2f   : > { %p1822_p3 = pnand %p1820_p10, %p1817_p6 }
  0x31   : > { %1825 = shalt.err (!%p1822_p3)
}
  0x32   : > { %s1826_s28 = scalar_lea.vmem %s2041_s6, 2048  ;;  %p1834_p12 = scmp.lt.s32.totalorder %s2041_s6, %s2041_s6 }
  0x33   : > { %p1827_p5 = scmp.ne.s32.totalorder %s2041_s6, %s1826_s28  ;;  %p1835_p0 = scmp.lt.s32.totalorder %s1826_s28, %s1826_s28 }
  0x35   : > { %p1829_p7 = pnand %p1827_p5, %p1787_p13  ;;  %p1836_p2 = por %p1835_p0, %p1834_p12 }
  0x37   : > { %p1830_p9 = pneg %p1829_p7 }
  0x39   : > { %p1837_p1 = pnand %p1836_p2, %p1830_p9 }
  0x3b   : > { %1840 = shalt.err (!%p1837_p1)
}
  0x3c   : > { %s1947_s12 = smov 64   ;;  %s1948_s13 = smov 4  }
  0x3d   : > { %1556 = dma.hbm_to_vmem [thread:$0]  (!%p2037_p11), %s2246_s3, 2048, %s2041_s6, [#allocation6], %s1947_s12, %s1947_s12, %s1948_s13  }
  0x3e   : > { %s2096_s16 = sadd.s32 1, %s1941_s21   ;;  %s29_s23 = sadd.s32 1, %s1937_s20 }
  0x3f   : > { %s26_s17 = ssub.s32 %s1941_s21, %s2096_s16  ;;  %p36_p6 = scmp.ne.s32.totalorder %s1937_s20, %s1933_s19 }
  0x40   : > { %p27_p13 = scmp.eq.s32.totalorder %s26_s17, 0  ;;  %p37_p10 = scmp.eq.s32.totalorder %s1941_s21, 0 }
  0x41   : > { %p2256_p5 = scmp.eq.s32.totalorder %s2007_s22, 1  ;;  %p1567_p9 = scmp.lt.s32.totalorder %s1941_s21, 2 }
  0x42   : > { %s2105_s27 = scalar_select %p27_p13, %s1937_s20, %s29_s23  }
  0x43   : > { %p38_p3 = por %p37_p10, %p36_p6  ;;  %p2109_p7 = por %p2256_p5, %p36_p6 }
  0x44   : > { %s208_s29 = sand.u32 1, %s1937_s20   ;;  %s1536_s6 = smul.u32 1792, %s1941_s21 }
  0x45   : > { %s2257_s30 = scalar_select %p2109_p7, 1, 0 }
  0x46   : > { %s1535_s7 = smul.u32 112, %s208_s29  ;;  %p2116_p11 = pnand %p1567_p9, %p38_p3 }
  0x47   : > { %s2123_s11 = scalar_lea.hbm %s2243_s0, %s1536_s6  ;;  %s2127_s13 = scalar_lea.sflag [#allocation3], %s208_s29 }
  0x48   : > { %s212_s28 = scalar_lea.vmem [#allocation2], %s1535_s7  ;;  %s1841_s14 = scalar_lea.hbm %s2123_s11, 1792 }
  0x49   : > { %s220_s12 = sshll.u32 %s212_s28, 4  ;;  %p1842_p12 = scmp.ne.s32.totalorder %s2123_s11, %s1841_s14  ;;  %s2125_s12 = int_to_ptr.vmem [resolvable:$true] %s220_s12 }
  0x4a   : > { %p1843_p0 = pneg %p2116_p11  ;;  %s1846_s23 = scalar_lea.hbm %s2243_s0, 3584 }
  0x4b   : > { %p1847_p13 = scmp.lt.u32.totalorder %s2123_s11, %s2243_s0  ;;  %p1848_p6 = scmp.lt.u32.totalorder %s1846_s23, %s1841_s14 }
  0x4c   : > { %p1844_p2 = pnand %p1843_p0, %p1842_p12  ;;  %p1850_p3 = scmp.lt.u32.totalorder %s1841_s14, %s2123_s11 }
  0x4d   : > { %p1849_p10 = por %p1848_p6, %p1847_p13 }
  0x4e   : > { %p1845_p1 = pneg %p1844_p2 }
  0x4f   : > { %p1851_p5 = por %p1850_p3, %p1849_p10 }
  0x51   : > { %p1852_p9 = pnand %p1851_p5, %p1845_p1 }
  0x53   : > { %1855 = shalt.err (!%p1852_p9)
}
  0x54   : > { %s1856_s29 = scalar_lea.vmem %s2125_s12, 1792  ;;  %s1949_s7 = smov [#allocation2]  }
  0x55   : > { %p1857_p12 = scmp.ne.s32.totalorder %s2125_s12, %s1856_s29  ;;  %s1861_s10 = sshll.u32 %s1949_s7, 4  ;;  %s1862_s10 = int_to_ptr.vmem [resolvable:$false] %s1861_s10 }
  0x56   : > { %s1863_s28 = scalar_lea.vmem %s1862_s10, 3584  ;;  %p1864_p4 = scmp.lt.s32.totalorder %s2125_s12, %s1862_s10 }
  0x57   : > { %p1859_p2 = pnand %p1857_p12, %p1843_p0  ;;  %p1865_p13 = scmp.lt.s32.totalorder %s1863_s28, %s1856_s29 }
  0x59   : > { %p1860_p7 = pneg %p1859_p2  ;;  %p1866_p6 = por %p1865_p13, %p1864_p4 }
  0x5b   : > { %p1867_p10 = pnand %p1866_p6, %p1860_p7 }
  0x5d   : > { %1870 = shalt.err (!%p1867_p10)
}
  0x5e   : > { %s1950_s14 = smov 896   ;;  %s1951_s15 = smov 56  }
  0x5f   : > { %1560 = dma.hbm_to_vmem [thread:$0]  (!%p2116_p11), %s2123_s11, 1792, %s2125_s12, %s2127_s13, %s1950_s14, %s1950_s14, %s1951_s15  }
  0x60   : > { %232 = sbr.rel (%p2026_p8) target bundleno = 703 (0x2bf), region = 40  ;;  %s2158_s17 = sand.u32 (!%p2026_p8), 1, %s1933_s19  }
  0x61   : > { %s1537_s23 = smul.u32 (!%p2026_p8), 112, %s2158_s17  ;;  %s235_s6 = scalar_lea.sflag (!%p2026_p8), [#allocation3], %s2158_s17 }
  0x62   : > { %p2259_p4 = scmp.ne.s32.totalorder (!%p2026_p8), %s2252_s24, 0 }
  0x63   : > { %s2162_s9 = scalar_lea.vmem (!%p2026_p8), [#allocation2], %s1537_s23 }
  0x67   : > { %1916 = dma.done.wait (%p2259_p4), %s235_s6, 1792  }
  0x68   : > { %1918 = vsyncadd (%p2259_p4), %s235_s6, 4294965504  ;;  %p2260_p7 = scmp.eq.s32.totalorder %s2007_s22, 0 }
  0x6a   : > { %1920 = dma.done.wait (%p2260_p7), [#allocation6], 14592   ;;  %p2261_p8 = pmov %p2260_p7 }
  0x6b   : > { %v1614_v0 = vld [vmem:[#allocation5 + $0x104] ss:$8 sps:$4 sm:$0xff]   ;;  %v1616_v1 = vld [vmem:[#allocation5 + $0x100] ss:$8 sps:$4 sm:$0xff]   ;;  %v1617_v2 = vld [vmem:[#allocation5 + $0x114] ss:$8 sps:$4 sm:$0xff]  }
  0x6c   : > { %1922 = vsyncadd (%p2261_p8), [#allocation6], 4294952704  ;;  %944 = vmatprep.subr.bf16.mxu0 %v1614_v0  ;;  %v1619_v3 = vld [vmem:[#allocation5 + $0x110] ss:$8 sps:$4 sm:$0xff]   ;;  %v1620_v4 = vld [vmem:[#allocation5 + $0x124] ss:$8 sps:$4 sm:$0xff]  }
  0x6d   : > { %945 = vmatpush1.bf16.msra.mxu0 %v1616_v1  ;;  %v1622_v5 = vld [vmem:[#allocation5 + $0x120] ss:$8 sps:$4 sm:$0xff]   ;;  %v1623_v6 = vld [vmem:[#allocation5 + $0x134] ss:$8 sps:$4 sm:$0xff]   ;;  %v1625_v7 = vld [vmem:[#allocation5 + $0x130] ss:$8 sps:$4 sm:$0xff]  }
  0x6e   : > { %946 = vmatprep.subr.bf16.mxu0 %v1617_v2  ;;  %v1626_v8 = vld [vmem:[#allocation5 + $0x144] ss:$8 sps:$4 sm:$0xff]   ;;  %v1628_v9 = vld [vmem:[#allocation5 + $0x140] ss:$8 sps:$4 sm:$0xff]   ;;  %v1629_v10 = vld [vmem:[#allocation5 + $0x154] ss:$8 sps:$4 sm:$0xff]  }
  0x6f   : > { %v1631_v11 = vld [vmem:[#allocation5 + $0x150] ss:$8 sps:$4 sm:$0xff]   ;;  %v1656_v12 = vld [vmem:[#allocation5 + $0x4] ss:$8 sps:$4 sm:$0xff]   ;;  %v1658_v13 = vld [vmem:[#allocation5] ss:$8 sps:$4 sm:$0xff]  }
  0x70   : > { %v1632_v14 = vld [vmem:[#allocation5 + $0x164] ss:$8 sps:$4 sm:$0xff]   ;;  %901 = vmatprep.subr.bf16.mxu1 %v1656_v12  ;;  %v1662_v15 = vld [vmem:[#allocation5 + $0x14] ss:$8 sps:$4 sm:$0xff]   ;;  %v1664_v16 = vld [vmem:[#allocation5 + $0x10] ss:$8 sps:$4 sm:$0xff]  }
  0x71   : > { %947 = vmatpush1.bf16.msra.mxu0 %v1619_v3  ;;  %902 = vmatpush1.bf16.msra.mxu1 %v1658_v13  ;;  %v1634_v17 = vld [vmem:[#allocation5 + $0x160] ss:$8 sps:$4 sm:$0xff]   ;;  %v1635_v18 = vld [vmem:[#allocation5 + $0x174] ss:$8 sps:$4 sm:$0xff]   ;;  %v1668_v19 = vld [vmem:[#allocation5 + $0x24] ss:$8 sps:$4 sm:$0xff]  }
  0x72   : > { %948 = vmatprep.subr.bf16.mxu0 %v1620_v4  ;;  %903 = vmatprep.subr.bf16.mxu1 %v1662_v15  ;;  %v279_v20 = vld [vmem:[%s2162_s9 + $0x18] sm:$0xff]  ;;  %v286_v21 = vld [vmem:[%s2162_s9 + $0x50] sm:$0xff]  ;;  %v285_v58 = vld [vmem:[%s2162_s9 + $0x48] sm:$0xff]  ;;  %vm897_vm0 = vcmask 130048   ;;  %s1374_s8 = sshll.u32 %s2158_s17, 4  ;;  %s1496_s7 = sshll.u32 %s2007_s22, 8 }
  0x73   : > { %v1670_v22 = vld [vmem:[#allocation5 + $0x20] ss:$8 sps:$4 sm:$0xff]   ;;  %v293_v23 = vpack.c.bf16 %v286_v21, %v279_v20  ;;  %v1637_v24 = vld [vmem:[#allocation5 + $0x170] ss:$8 sps:$4 sm:$0xff]   ;;  %v1638_v25 = vld [vmem:[#allocation5 + $0x184] ss:$8 sps:$4 sm:$0xff]   ;;  %s2199_s14 = scalar_lea.hbm %s2248_s5, %s1496_s7 }
  0x74   : > { %v1674_v26 = vld [vmem:[#allocation5 + $0x34] ss:$8 sps:$4 sm:$0xff]   ;;  %v1676_v27 = vld [vmem:[#allocation5 + $0x30] ss:$8 sps:$4 sm:$0xff]   ;;  %v1640_v28 = vld [vmem:[#allocation5 + $0x180] ss:$8 sps:$4 sm:$0xff]  }
  0x75   : > { %949 = vmatpush1.bf16.msra.mxu0 %v1622_v5  ;;  %904 = vmatpush1.bf16.msra.mxu1 %v1664_v16  ;;  %v1680_v29 = vld [vmem:[#allocation5 + $0x44] ss:$8 sps:$4 sm:$0xff]   ;;  %v1641_v30 = vld [vmem:[#allocation5 + $0x194] ss:$8 sps:$4 sm:$0xff]   ;;  %v1682_v31 = vld [vmem:[#allocation5 + $0x40] ss:$8 sps:$4 sm:$0xff]  }
  0x76   : > { %950 = vmatprep.subr.bf16.mxu0 %v1623_v6  ;;  %905 = vmatprep.subr.bf16.mxu1 %v1668_v19  ;;  %v1643_v32 = vld [vmem:[#allocation5 + $0x190] ss:$8 sps:$4 sm:$0xff]   ;;  %v1686_v33 = vld [vmem:[#allocation5 + $0x54] ss:$8 sps:$4 sm:$0xff]   ;;  %v1644_v34 = vld [vmem:[#allocation5 + $0x1a4] ss:$8 sps:$4 sm:$0xff]  }
  0x77   : > { %976 = vmatprep.mubr.bf16.mxu0 %v293_v23  ;;  %v1688_v35 = vld [vmem:[#allocation5 + $0x50] ss:$8 sps:$4 sm:$0xff]   ;;  %v1646_v36 = vld [vmem:[#allocation5 + $0x1a0] ss:$8 sps:$4 sm:$0xff]   ;;  %v1692_v37 = vld [vmem:[#allocation5 + $0x64] ss:$8 sps:$4 sm:$0xff]  }
  0x78   : > { %v1647_v38 = vld [vmem:[#allocation5 + $0x1b4] ss:$8 sps:$4 sm:$0xff]   ;;  %v1694_v39 = vld [vmem:[#allocation5 + $0x60] ss:$8 sps:$4 sm:$0xff]   ;;  %v1649_v40 = vld [vmem:[#allocation5 + $0x1b0] ss:$8 sps:$4 sm:$0xff]  }
  0x79   : > { %951 = vmatpush1.bf16.msra.mxu0 %v1625_v7  ;;  %906 = vmatpush1.bf16.msra.mxu1 %v1670_v22  ;;  %v1698_v41 = vld [vmem:[#allocation5 + $0x74] ss:$8 sps:$4 sm:$0xff]   ;;  %v1650_v42 = vld [vmem:[#allocation5 + $0x1c4] ss:$8 sps:$4 sm:$0xff]   ;;  %v1700_v43 = vld [vmem:[#allocation5 + $0x70] ss:$8 sps:$4 sm:$0xff]  }
  0x7a   : > { %952 = vmatprep.subr.bf16.mxu0 %v1626_v8  ;;  %907 = vmatprep.subr.bf16.mxu1 %v1674_v26  ;;  %v1652_v44 = vld [vmem:[#allocation5 + $0x1c0] ss:$8 sps:$4 sm:$0xff]   ;;  %v1704_v45 = vld [vmem:[#allocation5 + $0x84] ss:$8 sps:$4 sm:$0xff]   ;;  %v1653_v46 = vld [vmem:[#allocation5 + $0x1d4] ss:$8 sps:$4 sm:$0xff]  }
  0x7b   : > { %v1706_v47 = vld [vmem:[#allocation5 + $0x80] ss:$8 sps:$4 sm:$0xff]   ;;  %v1655_v48 = vld [vmem:[#allocation5 + $0x1d0] ss:$8 sps:$4 sm:$0xff]   ;;  %v1710_v49 = vld [vmem:[#allocation5 + $0x94] ss:$8 sps:$4 sm:$0xff]  }
  0x7c   : > { %v1659_v50 = vld [vmem:[#allocation5 + $0x1e4] ss:$8 sps:$4 sm:$0xff]   ;;  %v1712_v51 = vld [vmem:[#allocation5 + $0x90] ss:$8 sps:$4 sm:$0xff]   ;;  %v1661_v52 = vld [vmem:[#allocation5 + $0x1e0] ss:$8 sps:$4 sm:$0xff]  }
  0x7d   : > { %953 = vmatpush1.bf16.msra.mxu0 %v1628_v9  ;;  %908 = vmatpush1.bf16.msra.mxu1 %v1676_v27  ;;  %v1716_v53 = vld [vmem:[#allocation5 + $0xa4] ss:$8 sps:$4 sm:$0xff]   ;;  %v1665_v54 = vld [vmem:[#allocation5 + $0x1f4] ss:$8 sps:$4 sm:$0xff]   ;;  %v1667_v55 = vld [vmem:[#allocation5 + $0x1f0] ss:$8 sps:$4 sm:$0xff]  }
  0x7e   : > { %954 = vmatprep.subr.bf16.mxu0 %v1629_v10  ;;  %909 = vmatprep.subr.bf16.mxu1 %v1680_v29  ;;  %v278_v56 = vld [vmem:[%s2162_s9 + $0x10] sm:$0xff]  ;;  %v277_v63 = vld [vmem:[%s2162_s9 + $0x8] sm:$0xff]  ;;  %v284_v2 = vld [vmem:[%s2162_s9 + $0x40] sm:$0xff]  ;;  %s272_s13 = scalar_lea.vmem [#allocation8], %s1374_s8  ;;  %s1258_s15 = scalar_lea.sflag [#allocation4], %s2158_s17 }
  0x7f   : > { %v1718_v57 = vld [vmem:[#allocation5 + $0xa0] ss:$8 sps:$4 sm:$0xff]   ;;  %v1722_v59 = vld [vmem:[#allocation5 + $0xb4] ss:$8 sps:$4 sm:$0xff]   ;;  %v1673_v60 = vld [vmem:[#allocation5 + $0x204] ss:$8 sps:$4 sm:$0xff]   ;;  %v292_v61 = vpack.c.bf16 %v285_v58, %v278_v56  ;;  %v291_v4 = vpack.c.bf16 %v284_v2, %v277_v63 }
  0x80   : > { %v1724_v62 = vld [vmem:[#allocation5 + $0xb0] ss:$8 sps:$4 sm:$0xff]   ;;  %v1671_v0 = vld [vmem:[#allocation5 + $0x200] ss:$8 sps:$4 sm:$0xff]   ;;  %v1728_v1 = vld [vmem:[#allocation5 + $0xc4] ss:$8 sps:$4 sm:$0xff]  }
  0x81   : > { %955 = vmatpush1.bf16.msra.mxu0 %v1631_v11  ;;  %910 = vmatpush1.bf16.msra.mxu1 %v1682_v31  ;;  %v1679_v3 = vld [vmem:[#allocation5 + $0x214] ss:$8 sps:$4 sm:$0xff]   ;;  %v1730_v5 = vld [vmem:[#allocation5 + $0xc0] ss:$8 sps:$4 sm:$0xff]   ;;  %v1677_v6 = vld [vmem:[#allocation5 + $0x210] ss:$8 sps:$4 sm:$0xff]  }
  0x82   : > { %956 = vmatprep.subr.bf16.mxu0 %v1632_v14  ;;  %911 = vmatprep.subr.bf16.mxu1 %v1686_v33  ;;  %v1734_v7 = vld [vmem:[#allocation5 + $0xd4] ss:$8 sps:$4 sm:$0xff]   ;;  %v1685_v8 = vld [vmem:[#allocation5 + $0x224] ss:$8 sps:$4 sm:$0xff]   ;;  %v1683_v11 = vld [vmem:[#allocation5 + $0x220] ss:$8 sps:$4 sm:$0xff]  }
  0x83   : > { %933 = vmatprep.mubr.bf16.mxu1 %v291_v4  ;;  %v281_v9 = vld [vmem:[%s2162_s9 + $0x28] sm:$0xff]  ;;  %v288_v10 = vld [vmem:[%s2162_s9 + $0x60] sm:$0xff]  ;;  %v283_v22 = vld [vmem:[%s2162_s9 + $0x38] sm:$0xff]  ;;  %v1952_v31 = vmov 0   ;;  %s1271_s29 = sshll.u32 %s272_s13, 4  ;;  %p2262_p0 = scmp.ne.s32.totalorder %s2257_s30, 0  ;;  %s2194_s29 = int_to_ptr.vmem [resolvable:$true] %s1271_s29 }
  0x84   : > { %v295_v12 = vpack.c.bf16 %v288_v10, %v281_v9  ;;  %v1691_v13 = vld [vmem:[#allocation5 + $0x234] ss:$8 sps:$4 sm:$0xff]   ;;  %v1736_v14 = vld [vmem:[#allocation5 + $0xd0] ss:$8 sps:$4 sm:$0xff]   ;;  %v1740_v15 = vld [vmem:[#allocation5 + $0xe4] ss:$8 sps:$4 sm:$0xff]  }
  0x85   : > { %957 = vmatpush1.bf16.msra.mxu0 %v1634_v17  ;;  %912 = vmatpush1.bf16.msra.mxu1 %v1688_v35  ;;  %v1742_v16 = vld [vmem:[#allocation5 + $0xe0] ss:$8 sps:$4 sm:$0xff]   ;;  %v1689_v17 = vld [vmem:[#allocation5 + $0x230] ss:$8 sps:$4 sm:$0xff]   ;;  %v1697_v19 = vld [vmem:[#allocation5 + $0x244] ss:$8 sps:$4 sm:$0xff]  }
  0x86   : > { %958 = vmatprep.subr.bf16.mxu0 %v1635_v18  ;;  %913 = vmatprep.subr.bf16.mxu1 %v1692_v37  ;;  %v1746_v18 = vld [vmem:[#allocation5 + $0xf4] ss:$8 sps:$4 sm:$0xff]   ;;  %v1748_v20 = vld [vmem:[#allocation5 + $0xf0] ss:$8 sps:$4 sm:$0xff]   ;;  %v1695_v23 = vld [vmem:[#allocation5 + $0x240] ss:$8 sps:$4 sm:$0xff]  }
  0x87   : > { %v276_v21 = vld [vmem:[%s2162_s9] sm:$0xff]  ;;  %v289_v33 = vld [vmem:[%s2162_s9 + $0x68] sm:$0xff]  ;;  %s1871_s23 = scalar_lea.vmem %s2194_s29, 256  ;;  %s1953_s22 = smov [#allocation8]  }
  0x88   : > { %v290_v26 = vpack.c.bf16 %v283_v22, %v276_v21  ;;  %v1755_v27 = vld [vmem:[#allocation5 + $0x300] ss:$8 sps:$4 sm:$0xff]   ;;  %v1761_v29 = vld [vmem:[#allocation7 + $0x40] sm:$0xff]   ;;  %v1763_v58 = vld [vmem:[#allocation7 + $0x48] sm:$0xff]   ;;  %p1872_p11 = scmp.ne.s32.totalorder %s2194_s29, %s1871_s23  ;;  %s1875_s6 = sshll.u32 %s1953_s22, 4  ;;  %s1876_s6 = int_to_ptr.vmem [resolvable:$false] %s1875_s6 }
  0x89   : > { %959 = vmatpush1.bf16.msra.mxu0 %v1637_v24  ;;  %914 = vmatpush1.bf16.msra.mxu1 %v1694_v39  ;;  %v1757_v24 = vld [vmem:[#allocation5 + $0x304] ss:$8 sps:$4 sm:$0xff]   ;;  %v1715_v35 = vld [vmem:[#allocation5 + $0x274] ss:$8 sps:$4 sm:$0xff]   ;;  %v1713_v37 = vld [vmem:[#allocation5 + $0x270] ss:$8 sps:$4 sm:$0xff]   ;;  %p1878_p5 = scmp.lt.s32.totalorder %s2194_s29, %s1876_s6 }
  0x8a   : > { %960 = vmatprep.subr.bf16.mxu0 %v1638_v25  ;;  %915 = vmatprep.subr.bf16.mxu1 %v1698_v41  ;;  %v1703_v25 = vld [vmem:[#allocation5 + $0x254] ss:$8 sps:$4 sm:$0xff]   ;;  %v1719_v39 = vld [vmem:[#allocation5 + $0x280] ss:$8 sps:$4 sm:$0xff]   ;;  %v1725_v41 = vld [vmem:[#allocation5 + $0x290] ss:$8 sps:$4 sm:$0xff]   ;;  %p1873_p1 = pnand %p1872_p11, %p2262_p0 }
  0x8b   : > { %v1768_v63 = vld [vmem:[#allocation7 + $0x18] sm:$0xff]   ;;  %v1771_v2 = vld [vmem:[#allocation7 + $0x68] sm:$0xff]   ;;  %v1773_v4 = vld [vmem:[#allocation7 + $0x70] sm:$0xff]  }
  0x8c   : > { %p1874_p3 = pneg %p1873_p1 }
  0x8d   : > { %961 = vmatpush1.bf16.msra.mxu0 %v1640_v28  ;;  %916 = vmatpush1.bf16.msra.mxu1 %v1700_v43  ;;  %v1701_v28 = vld [vmem:[#allocation5 + $0x250] ss:$8 sps:$4 sm:$0xff]   ;;  %v1731_v43 = vld [vmem:[#allocation5 + $0x2a0] ss:$8 sps:$4 sm:$0xff]  }
  0x8e   : > { %962 = vmatprep.subr.bf16.mxu0 %v1641_v30  ;;  %917 = vmatprep.subr.bf16.mxu1 %v1704_v45  ;;  %v1709_v30 = vld [vmem:[#allocation5 + $0x264] ss:$8 sps:$4 sm:$0xff]   ;;  %v1737_v45 = vld [vmem:[#allocation5 + $0x2b0] ss:$8 sps:$4 sm:$0xff]  }
  0x91   : > { %963 = vmatpush1.bf16.msra.mxu0 %v1643_v32  ;;  %918 = vmatpush1.bf16.msra.mxu1 %v1706_v47  ;;  %v282_v32 = vld [vmem:[%s2162_s9 + $0x30] sm:$0xff] }
  0x92   : > { %964 = vmatprep.subr.bf16.mxu0 %v1644_v34  ;;  %919 = vmatprep.subr.bf16.mxu1 %v1710_v49  ;;  %v1707_v34 = vld [vmem:[#allocation5 + $0x260] ss:$8 sps:$4 sm:$0xff]   ;;  %v1749_v49 = vld [vmem:[#allocation5 + $0x2d0] ss:$8 sps:$4 sm:$0xff]  }
  0x93   : > { %v1743_v47 = vld [vmem:[#allocation5 + $0x2c0] ss:$8 sps:$4 sm:$0xff]  }
  0x95   : > { %965 = vmatpush1.bf16.msra.mxu0 %v1646_v36  ;;  %920 = vmatpush1.bf16.msra.mxu1 %v1712_v51  ;;  %v296_v36 = vpack.c.bf16 %v289_v33, %v282_v32  ;;  %v1752_v51 = vld [vmem:[#allocation5 + $0x2e0] ss:$8 sps:$4 sm:$0xff]  }
  0x96   : > { %966 = vmatprep.subr.bf16.mxu0 %v1647_v38  ;;  %921 = vmatprep.subr.bf16.mxu1 %v1716_v53  ;;  %v1721_v38 = vld [vmem:[#allocation5 + $0x284] ss:$8 sps:$4 sm:$0xff]   ;;  %v1758_v53 = vld [vmem:[#allocation5 + $0x2f0] ss:$8 sps:$4 sm:$0xff]  }
  0x99   : > { %967 = vmatpush1.bf16.msra.mxu0 %v1649_v40  ;;  %922 = vmatpush1.bf16.msra.mxu1 %v1718_v57  ;;  %v1727_v40 = vld [vmem:[#allocation5 + $0x294] ss:$8 sps:$4 sm:$0xff]  }
  0x9a   : > { %968 = vmatprep.subr.bf16.mxu0 %v1650_v42  ;;  %923 = vmatprep.subr.bf16.mxu1 %v1722_v59  ;;  %v1733_v42 = vld [vmem:[#allocation5 + $0x2a4] ss:$8 sps:$4 sm:$0xff]   ;;  %v1762_v57 = vld [vmem:[#allocation7] sm:$0xff]   ;;  %v1764_v59 = vld [vmem:[#allocation7 + $0x8] sm:$0xff]  }
  0x9d   : > { %969 = vmatpush1.bf16.msra.mxu0 %v1652_v44  ;;  %924 = vmatpush1.bf16.msra.mxu1 %v1724_v62  ;;  %v1739_v44 = vld [vmem:[#allocation5 + $0x2b4] ss:$8 sps:$4 sm:$0xff]   ;;  %v1767_v62 = vld [vmem:[#allocation7 + $0x58] sm:$0xff]  }
  0x9e   : > { %970 = vmatprep.subr.bf16.mxu0 %v1653_v46  ;;  %925 = vmatprep.subr.bf16.mxu1 %v1728_v1  ;;  %v1745_v46 = vld [vmem:[#allocation5 + $0x2c4] ss:$8 sps:$4 sm:$0xff]   ;;  %v1770_v1 = vld [vmem:[#allocation7 + $0x20] sm:$0xff]  }
  0xa1   : > { %971 = vmatpush1.bf16.msra.mxu0 %v1655_v48  ;;  %926 = vmatpush1.bf16.msra.mxu1 %v1730_v5  ;;  %v1751_v48 = vld [vmem:[#allocation5 + $0x2d4] ss:$8 sps:$4 sm:$0xff]   ;;  %v1774_v5 = vld [vmem:[#allocation7 + $0x30] sm:$0xff]  }
  0xa2   : > { %972 = vmatprep.subr.bf16.mxu0 %v1659_v50  ;;  %927 = vmatprep.subr.bf16.mxu1 %v1734_v7  ;;  %v1754_v50 = vld [vmem:[#allocation5 + $0x2e4] ss:$8 sps:$4 sm:$0xff]  }
  0xa3   : > { %v1776_v7 = vld [vmem:[#allocation7 + $0x38] sm:$0xff]  }
  0xa5   : > { %973 = vmatpush1.bf16.msra.mxu0 %v1661_v52  ;;  %928 = vmatpush1.bf16.msra.mxu1 %v1736_v14  ;;  %v1760_v52 = vld [vmem:[#allocation5 + $0x2f4] ss:$8 sps:$4 sm:$0xff]  }
  0xa6   : > { %974 = vmatprep.subr.bf16.mxu0 %v1665_v54  ;;  %929 = vmatprep.subr.bf16.mxu1 %v1740_v15  ;;  %v280_v54 = vld [vmem:[%s2162_s9 + $0x20] sm:$0xff] }
  0xa9   : > { %975 = vmatpush1.bf16.msra.mxu0 %v1667_v55  ;;  %930 = vmatpush1.bf16.msra.mxu1 %v1742_v16  ;;  %v287_v55 = vld [vmem:[%s2162_s9 + $0x58] sm:$0xff]  ;;  %v397_v16 = vlaneseq  ;;  %s1877_s9 = scalar_lea.vmem %s1876_s6, 512 }
  0xaa   : > { %987 = vmatprep.subr.bf16.mxu0 %v1673_v60  ;;  %931 = vmatprep.subr.bf16.mxu1 %v1746_v18  ;;  %v294_v56 = vpack.c.bf16 %v287_v55, %v280_v54  ;;  %v1765_v60 = vld [vmem:[#allocation7 + $0x50] sm:$0xff]   ;;  %p1879_p9 = scmp.lt.s32.totalorder %s1877_s9, %s1871_s23 }
  0xac   : > { %977 = vmatmul.mubr.bf16.vlgmr.msra.gmra.mrb[0].mxu0 %v292_v61  ;;  %v1766_v61 = vld [vmem:[#allocation7 + $0x10] sm:$0xff]   ;;  %p1880_p12 = por %p1879_p9, %p1878_p5 }
  0xad   : > { %988 = vmatpush1.bf16.msra.mxu0 %v1671_v0  ;;  %1019 = vmatprep.mubr.bf16.mxu0 %v295_v12  ;;  %v1769_v0 = vld [vmem:[#allocation7 + $0x60] sm:$0xff]  }
  0xae   : > { %989 = vmatprep.subr.bf16.mxu0 %v1679_v3  ;;  %932 = vmatpush1.bf16.msra.mxu1 %v1748_v20  ;;  %v1772_v3 = vld [vmem:[#allocation7 + $0x28] sm:$0xff]   ;;  %p1881_p2 = pnand %p1880_p12, %p1874_p3 }
  0xaf   : > { %1030 = vmatprep.subr.bf16.mxu1 %v1757_v24 }
  0xb1   : > { %990 = vmatpush1.bf16.msra.mxu0 %v1677_v6  ;;  %934 = vmatmul.mubr.bf16.vlgmr.msra.gmra.mrb[0].mxu1 %v290_v26  ;;  %v1775_v6 = vld [vmem:[#allocation7 + $0x78] sm:$0xff]  }
  0xb2   : > { %991 = vmatprep.subr.bf16.mxu0 %v1685_v8  ;;  %1031 = vmatpush1.bf16.msra.mxu1 %v1755_v27 }
  0xb3   : > { %1062 = vmatprep.mubr.bf16.mxu1 %v1952_v31  ;;  %1497 = vmatprep.subr.bf16.mxu1 %v1761_v29 }
  0xb5   : > { %992 = vmatpush1.bf16.msra.mxu0 %v1683_v11 }
  0xb6   : > { %993 = vmatprep.subr.bf16.mxu0 %v1691_v13 }
  0xb9   : > { %994 = vmatpush1.bf16.msra.mxu0 %v1689_v17  ;;  %1473 = vmatmul.mubr.msk.bf16.vlgmr.msra.gmra.mrb[4].mxu1 %vm897_vm0, %v296_v36  ;;  %v398_v17 = vshrl.u32 %v397_v16, 7 }
  0xba   : > { %995 = vmatprep.subr.bf16.mxu0 %v1697_v19  ;;  %1498 = vmatpush3.bf16.msra.mxu1 %v1762_v57  ;;  %v395_v19 = vld [vmem:[%s2245_s2] sm:$0x3] }
  0xbb   : > { %1499 = vmatprep.subr.bf16.mxu1 %v1763_v58  ;;  %v399_v18 = vsub.s32 0, %v398_v17  ;;  %v403_v20 = vsub.s32 1, %v398_v17 }
  0xbd   : > { %996 = vmatpush1.bf16.msra.mxu0 %v1695_v23  ;;  %v400_v21 = vrot.slane %v395_v19, %v399_v18  ;;  %v404_v22 = vrot.slane %v395_v19, %v403_v20 }
  0xbe   : > { %997 = vmatprep.subr.bf16.mxu0 %v1703_v25  ;;  %1500 = vmatpush3.bf16.msra.mxu1 %v1764_v59 }
  0xbf   : > { %1501 = vmatprep.subr.bf16.mxu1 %v1765_v60 }
  0xc1   : > { %998 = vmatpush1.bf16.msra.mxu0 %v1701_v28 }
  0xc2   : > { %999 = vmatprep.subr.bf16.mxu0 %v1709_v30  ;;  %1502 = vmatpush3.bf16.msra.mxu1 %v1766_v61 }
  0xc3   : > { %1503 = vmatprep.subr.bf16.mxu1 %v1767_v62 }
  0xc5   : > { %1000 = vmatpush1.bf16.msra.mxu0 %v1707_v34 }
  0xc6   : > { %1001 = vmatprep.subr.bf16.mxu0 %v1715_v35  ;;  %1504 = vmatpush3.bf16.msra.mxu1 %v1768_v63 }
  0xc7   : > { %1505 = vmatprep.subr.bf16.mxu1 %v1769_v0 }
  0xc9   : > { %1002 = vmatpush1.bf16.msra.mxu0 %v1713_v37 }
  0xca   : > { %1003 = vmatprep.subr.bf16.mxu0 %v1721_v38  ;;  %1506 = vmatpush3.bf16.msra.mxu1 %v1770_v1 }
  0xcb   : > { %1507 = vmatprep.subr.bf16.mxu1 %v1771_v2 }
  0xcd   : > { %1004 = vmatpush1.bf16.msra.mxu0 %v1719_v39 }
  0xce   : > { %1005 = vmatprep.subr.bf16.mxu0 %v1727_v40  ;;  %1508 = vmatpush3.bf16.msra.mxu1 %v1772_v3 }
  0xcf   : > { %1509 = vmatprep.subr.bf16.mxu1 %v1773_v4 }
  0xd1   : > { %1006 = vmatpush1.bf16.msra.mxu0 %v1725_v41 }
  0xd2   : > { %1007 = vmatprep.subr.bf16.mxu0 %v1733_v42  ;;  %1510 = vmatpush3.bf16.msra.mxu1 %v1774_v5 }
  0xd3   : > { %1511 = vmatprep.subr.bf16.mxu1 %v1775_v6 }
  0xd5   : > { %1008 = vmatpush1.bf16.msra.mxu0 %v1731_v43 }
  0xd6   : > { %1009 = vmatprep.subr.bf16.mxu0 %v1739_v44  ;;  %1512 = vmatpush3.bf16.msra.mxu1 %v1776_v7 }
  0xd9   : > { %1010 = vmatpush1.bf16.msra.mxu0 %v1737_v45 }
  0xda   : > { %1011 = vmatprep.subr.bf16.mxu0 %v1745_v46  ;;  %v1474_v46 = vld [vmem:[%s2247_s4] ss:$0 sm:$0xff] }
  0xdd   : > { %1012 = vmatpush1.bf16.msra.mxu0 %v1743_v47 }
  0xde   : > { %1013 = vmatprep.subr.bf16.mxu0 %v1751_v48 }
  0xe1   : > { %1014 = vmatpush1.bf16.msra.mxu0 %v1749_v49 }
  0xe2   : > { %1015 = vmatprep.subr.bf16.mxu0 %v1754_v50 }
  0xe5   : > { %1016 = vmatpush1.bf16.msra.mxu0 %v1752_v51 }
  0xe6   : > { %1017 = vmatprep.subr.bf16.mxu0 %v1760_v52 }
  0xe9   : > { %1018 = vmatpush1.bf16.msra.mxu0 %v1758_v53 }
  0xec   : > { %1020 = vmatmul.mubr.bf16.vlgmr.msra.gmra.mrb[0].mxu0 %v294_v56 }
 0x184   : > { %v935_v8 = vpop.f32.mrb[0].mxu1 }
 0x185   : > { %v937_v9 = vpop.f32.mrb[1].mxu1  ;;  %v936_v23 = vadd.f32 %v935_v8, %v400_v21 }
 0x186   : > { %v939_v10 = vpop.f32.mrb[2].mxu1  ;;  %v938_v24 = vadd.f32 %v937_v9, %v404_v22 }
 0x187   : > { %v941_v11 = vpop.f32.mrb[3].mxu1  ;;  %v940_v26 = vadd.f32 %v939_v10, %v400_v21 }
 0x188   : > { %v942_v29 = vadd.f32 %v941_v11, %v404_v22 }
 0x18c   : > { %v1064_v12 = vpop.f32.mrb[4].mxu1 }
 0x18d   : > { %v1066_v13 = vpop.f32.mrb[5].mxu1 }
 0x18e   : > { %v1068_v14 = vpop.f32.mrb[6].mxu1 }
 0x18f   : > { %v1070_v15 = vpop.f32.mrb[7].mxu1 }
 0x1bf   : > { %v1021_v25 = vpop.f32.mrb[0].mxu0 }
 0x1c0   : > { %v1520_v27 = vadd.f32 %v1021_v25, %v936_v23  ;;  %v1023_v28 = vpop.f32.mrb[1].mxu0 }
 0x1c1   : > { %v1523_v30 = vadd.f32 %v1023_v28, %v938_v24  ;;  %v1025_v31 = vpop.f32.mrb[2].mxu0 }
 0x1c2   : > { %v1521_v32 = vadd.f32 %v1520_v27, %v1064_v12  ;;  %v1526_v33 = vadd.f32 %v1025_v31, %v940_v26  ;;  %v1027_v34 = vpop.f32.mrb[3].mxu0 }
 0x1c3   : > { %v1524_v35 = vadd.f32 %v1523_v30, %v1066_v13  ;;  %v1529_v36 = vadd.f32 %v1027_v34, %v942_v29 }
 0x1c4   : > { %1777 = vtanh.f32 %v1521_v32  ;;  %v1527_v37 = vadd.f32 %v1526_v33, %v1068_v14 }
 0x1c5   : > { %1779 = vtanh.f32 %v1524_v35  ;;  %v1530_v38 = vadd.f32 %v1529_v36, %v1070_v15 }
 0x1c6   : > { %1781 = vtanh.f32 %v1527_v37 }
 0x1c7   : > { %1783 = vtanh.f32 %v1530_v38 }
 0x1ce   : > { %v1778_v39 = vpop.eup %1777 }
 0x1cf   : > { %v1780_v40 = vpop.eup %1779 }
 0x1d0   : > { %v1782_v41 = vpop.eup %1781 }
 0x1d1   : > { %v1784_v42 = vpop.eup %1783  ;;  %v1077_v43 = vpack.c.bf16 %v1782_v41, %v1778_v39 }
 0x1d2   : > { %v1078_v44 = vpack.c.bf16 %v1784_v42, %v1780_v40 }
 0x1d4   : > { %1246 = vmatprep.mubr.bf16.mxu1 %v1078_v44 }
 0x1d5   : > { %1247 = vmatmul.mubr.bf16.vlgmr.msra.gmra.mrb[8].mxu1 %v1077_v43 }
 0x2a8   : > { %v1513_v45 = vpop.f32.mrb[8].mxu1 }
 0x2a9   : > { %v1514_v47 = vpop.f32.mrb[9].mxu1 }
 0x2aa   : > { %v1515_v48 = vadd.f32 %v1514_v47, %v1513_v45  ;;  %v1516_v49 = vpop.f32.mrb[10].mxu1 }
 0x2ab   : > { %v1517_v50 = vpop.f32.mrb[11].mxu1 }
 0x2ac   : > { %v1249_v51 = vadd.f32 %v1515_v48, %v1474_v46  ;;  %v1518_v52 = vadd.f32 %v1517_v50, %v1516_v49 }
 0x2ae   : > { %1255 = vst [vmem:[%s272_s13] sm:$0xff] %v1249_v51  ;;  %v1252_v53 = vadd.f32 %v1518_v52, %v1474_v46 }
 0x2b0   : > { %1256 = vst [vmem:[%s272_s13 + $0x8] sm:$0xff] %v1252_v53 }
 0x2b1   : > { %1884 = shalt.err (!%p1881_p2)
}
 0x2b2   : > { %s1885_s24 = scalar_lea.hbm %s2199_s14, 256  ;;  %s1889_s11 = scalar_lea.hbm %s2248_s5, 512 }
 0x2b3   : > { %p1886_p13 = scmp.ne.s32.totalorder %s2199_s14, %s1885_s24  ;;  %p1890_p4 = scmp.lt.u32.totalorder %s2199_s14, %s2248_s5 }
 0x2b4   : > { %p1891_p7 = scmp.lt.u32.totalorder %s1889_s11, %s1885_s24  ;;  %p1893_p11 = scmp.lt.u32.totalorder %s1885_s24, %s2199_s14 }
 0x2b5   : > { %p1887_p6 = pnand %p1886_p13, %p2262_p0 }
 0x2b6   : > { %p1892_p8 = por %p1891_p7, %p1890_p4 }
 0x2b7   : > { %p1888_p10 = pneg %p1887_p6 }
 0x2b8   : > { %p1894_p1 = por %p1893_p11, %p1892_p8 }
 0x2ba   : > { %p1895_p3 = pnand %p1894_p1, %p1888_p10 }
 0x2bc   : > { %1898 = shalt.err (!%p1895_p3)
}
 0x2bd   : > { %s1954_s7 = smov 128   ;;  %s1955_s10 = smov 8  }
 0x2be   : > { %1548 = dma.vmem_to_hbm [thread:$0]  (%p2262_p0), %s2194_s29, 256, %s2199_s14, %s1258_s15, %s1954_s7, %s1954_s7, %s1955_s10  }
 0x2bf PF: > { %s1286_s28 = sand.u32 1, %s1929_s18   ;;  %p2263_p5 = scmp.ne.s32.totalorder %s2253_s25, 0 }
 0x2c0   : > { %p2264_p9 = scmp.ge.s32.totalorder %s1941_s21, 2  ;;  %s1287_s23 = scalar_lea.sflag [#allocation4], %s1286_s28 }
 0x2c2   : > { %p1562_p12 = pnand %p2264_p9, %p2263_p5 }
 0x2c4   : > { %1924 = dma.done.wait (!%p1562_p12), %s1287_s23, 256  }
 0x2c5   : > { %1926 = vsyncadd (!%p1562_p12), %s1287_s23, 4294967040  ;;  %p19_p2 = scmp.ge.s32.totalorder %s2096_s16, 4   ;;  %s2265_s18 = smov %s1933_s19 }
 0x2c6   : > { %s2266_s19 = smov %s1937_s20  ;;  %s2267_s20 = smov %s2105_s27 }
 0x2c7   : > { %s2268_s21 = smov %s2096_s16  ;;  %21 = sbr.rel (!%p19_p2) target bundleno = 6 (0x6), region = 93 }
 0x2ce   :  { %1292 = vsyncpa [#allocation3], 1 }
 0x2cf   :  { %1294 = vsyncpa [#allocation3 + $0x1], 1 }
 0x2d0   :  { %1295 = vsyncpa [#allocation6], 1 }
 0x2d1   :  { %1296 = vsyncpa [#allocation4], 1 }
 0x2d2   :  { %1298 = vsyncpa [#allocation4 + $0x1], 1 }

</bundles_post_ra>
